<compile_context>
chip_gen: v5e
topology: v5e:2x2
jax: 0.10.0
libtpu: 0.0.40
codegen_flags: <defaults>
</compile_context>

<pallas_src>
import jax
import jax.numpy as jnp
from jax.experimental import pallas as pl
from jax.experimental.pallas import tpu as pltpu


def _linear_tanh_kernel(x_ref, w_ref, b_ref, o_ref):
    # o = tanh(x @ w + b); MXU matmul with f32 accumulation, bias add on the
    # VPU, tanh on the EUP (its own bundle slot -> effectively free).
    y = jnp.dot(x_ref[...], w_ref[...], preferred_element_type=jnp.float32)
    o_ref[...] = jnp.tanh(y + b_ref[...]).astype(o_ref.dtype)


def single_observation_encoder(obs, w, b, *, block_rows=1024, use_bf16_inputs=False):
    """tanh(obs @ w + b).

    obs: (B, obs_dim) f32, w: (obs_dim, 32) f32, b: (32,) f32 -> (B, 32) f32.
    block_rows: packed rows per grid step (each packed row = `pack` batch rows).
    """
    B, obs_dim = obs.shape
    hidden = w.shape[1]
    # Pack `pack` batch rows into one 128-lane output row (pack=4 for hidden=32).
    pack = 128 // hidden if 128 % hidden == 0 else 1

    # Pad B only up to a multiple of `pack` (cheap / usually a no-op).
    Bp = -(-B // pack) * pack
    if Bp != B:
        obs = jnp.pad(obs, ((0, Bp - B), (0, 0)))
    R = Bp // pack                    # packed rows
    Wx = pack * obs_dim               # packed input width
    Wo = pack * hidden                # packed output width (128 for hidden=32)

    # Lane-dense repack, all done once in the wrapper (outside the kernel):
    #   x_packed[i, j*obs_dim + k] = obs[pack*i + j, k]   (free row-major reshape)
    #   w_packed = kron(I_pack, w)   -> block-diagonal (pack*obs_dim, 128)
    #   b_packed = tile(b, pack)     -> (1, 128)
    # so tanh(x_packed @ w_packed + b_packed).reshape(Bp, hidden) == tanh(obs @ w + b).
    x_packed = obs.reshape(R, Wx)
    w_packed = jnp.kron(jnp.eye(pack, dtype=w.dtype), w) if pack > 1 else w
    b_packed = jnp.tile(b.reshape(1, hidden), (1, pack))

    if use_bf16_inputs:  # v6e/v7x: bf16-native MXU, halves HBM bytes on obs
        x_packed = x_packed.astype(jnp.bfloat16)
        w_packed = w_packed.astype(jnp.bfloat16)

    tb = max(8, (block_rows // 8) * 8)  # packed rows per grid step (multiple of 8)

    if R <= tb:
        # Overhead-bound regime: single un-pipelined call, everything in VMEM.
        vmem = pl.BlockSpec(memory_space=pltpu.MemorySpace.VMEM)
        out_packed = pl.pallas_call(
            _linear_tanh_kernel,
            out_shape=jax.ShapeDtypeStruct((R, Wo), jnp.float32),
            in_specs=[vmem, vmem, vmem],
            out_specs=vmem,
        )(x_packed, w_packed, b_packed)
    else:
        n_tiles = pl.cdiv(R, tb)  # partial last tile handled by Pallas
        out_packed = pl.pallas_call(
            _linear_tanh_kernel,
            out_shape=jax.ShapeDtypeStruct((R, Wo), jnp.float32),
            grid=(n_tiles,),
            in_specs=[
                pl.BlockSpec((tb, Wx), lambda i: (i, 0)),
                pl.BlockSpec((Wx, Wo), lambda i: (0, 0)),   # weight VMEM-resident
                pl.BlockSpec((1, Wo), lambda i: (0, 0)),    # bias   VMEM-resident
            ],
            out_specs=pl.BlockSpec((tb, Wo), lambda i: (i, 0)),
            compiler_params=pltpu.CompilerParams(
                dimension_semantics=("parallel",),  # lets v7x shard batch over its 2 TCs
            ),
        )(x_packed, w_packed, b_packed)

    return out_packed.reshape(Bp, hidden)[:B]


def reference(obs, w, b):
    return jnp.tanh(obs @ w + b)


if __name__ == "__main__":
    key = jax.random.PRNGKey(0)
    k_obs, k_w, k_b = jax.random.split(key, 3)

    obs_dim = 16   # observation dimension
    hidden = 32    # fixed by the module: dims = [obs_dim] + [32]

    bound = 1.0 / jnp.sqrt(obs_dim)
    w = jax.random.uniform(k_w, (obs_dim, hidden), jnp.float32, -bound, bound)
    b = jax.random.uniform(k_b, (hidden,), jnp.float32, -bound, bound)

    # 1) Module-sized small batch -> single un-pipelined whole-VMEM call.
    B_small = 8
    obs_small = jax.random.normal(k_obs, (B_small, obs_dim), dtype=jnp.float32)
    out_small = jax.block_until_ready(single_observation_encoder(obs_small, w, b))
    ref_small = reference(obs_small, w, b)
    assert out_small.shape == (B_small, hidden)
    assert jnp.allclose(out_small, ref_small, atol=2e-5, rtol=2e-5), "small-path mismatch"

    # 2) Batched path: grid over packed batch rows, lane-dense 128-wide output,
    #    f32 MXU operands.  B is deliberately not a multiple of the tile (and
    #    not of the pack factor) to exercise padding + partial last tile.
    B_big = 1030
    obs_big = jax.random.normal(k_obs, (B_big, obs_dim), dtype=jnp.float32)
    out_big = jax.block_until_ready(
        single_observation_encoder(obs_big, w, b, block_rows=128))
    ref_big = reference(obs_big, w, b)
    assert out_big.shape == (B_big, hidden)
    assert jnp.allclose(out_big, ref_big, atol=2e-5, rtol=2e-5), "tiled-path mismatch"

    # 3) Batched path with bf16 MXU operands (v6e/v7x recommendation), f32 accumulate.
    out_bf16 = jax.block_until_ready(
        single_observation_encoder(obs_big, w, b, block_rows=128, use_bf16_inputs=True))
    assert jnp.allclose(out_bf16, ref_big, atol=3e-2, rtol=3e-2), "bf16-path mismatch"

    print("KERNEL_OK")
</pallas_src>

<mosaic_0001>
module attributes {stable_mosaic.version = 11 : i64} {
  func.func @_linear_tanh_kernel(%arg0: memref<2x64xf32, #tpu.memory_space<vmem>>, %arg1: memref<64x128xf32, #tpu.memory_space<vmem>>, %arg2: memref<1x128xf32, #tpu.memory_space<vmem>>, %arg3: memref<2x128xf32, #tpu.memory_space<vmem>>) attributes {dimension_semantics = [], scalar_prefetch = 0 : i64, scratch_operands = 0 : i64, tpu.core_type = #tpu.core_type<tc>} {
    %c0 = arith.constant 0 : index
    %c0_0 = arith.constant 0 : index
    %0 = vector.load %arg0[%c0, %c0_0] : memref<2x64xf32, #tpu.memory_space<vmem>>, vector<2x64xf32>
    %c0_1 = arith.constant 0 : index
    %c0_2 = arith.constant 0 : index
    %1 = vector.load %arg1[%c0_1, %c0_2] : memref<64x128xf32, #tpu.memory_space<vmem>>, vector<64x128xf32>
    %cst = arith.constant dense<0.000000e+00> : vector<2x128xf32>
    %2 = tpu.matmul %0, %1, %cst {dimension_numbers = #tpu.dot_dimension_numbers<[1], [0], [0], [1], [0, 0, 1, 1], [], []>} : vector<2x64xf32>, vector<64x128xf32>, vector<2x128xf32> -> vector<2x128xf32>
    %c0_3 = arith.constant 0 : index
    %c0_4 = arith.constant 0 : index
    %3 = vector.load %arg2[%c0_3, %c0_4] : memref<1x128xf32, #tpu.memory_space<vmem>>, vector<1x128xf32>
    %4 = vector.broadcast %3 : vector<1x128xf32> to vector<2x128xf32>
    %5 = arith.addf %2, %4 : vector<2x128xf32>
    %6 = math.tanh %5 : vector<2x128xf32>
    %c0_5 = arith.constant 0 : index
    %c0_6 = arith.constant 0 : index
    %7 = vector.load %arg3[%c0_5, %c0_6] : memref<2x128xf32, #tpu.memory_space<vmem>>, vector<2x128xf32>
    tpu.vector_store %arg3[%c0_5, %c0_6], %6 {strides = array<i32>} : memref<2x128xf32, #tpu.memory_space<vmem>>, vector<2x128xf32>,
    return
  }
}

</mosaic_0001>

<bundles_post_ra>
// kernel: tpu_custom_call.1
= control target key start
LH: loop header
LB: loop body
LE: loop exit
PB: predicated region body
PF: predicated region fallthrough
CT: control target
= control target key end

     0   :  { %8 = vsyncpa [#allocation3], 0  ;;  %s226_s0 = inlined_call_operand.hbm [shape: f32[2,64], index: 0, kind: input, shape index: {}]   ;;  %s227_s1 = inlined_call_operand.hbm [shape: f32[64,128], index: 1, kind: input, shape index: {}]   ;;  %s228_s2 = inlined_call_operand.vmem [shape: f32[1,128], index: 2, kind: input, shape index: {}]   ;;  %s229_s3 = inlined_call_operand.hbm [shape: f32[2,128], index: 3, kind: output, shape index: {}]  }
   0x1   :  { %9 = vsyncpa [#allocation6], 0 }
   0x2   :  { %10 = vsyncpa [#allocation4], 0  ;;  %s16_s14 = sshll.u32 %s226_s0, 4  ;;  %s189_s15 = smov [#allocation2]   ;;  %s17_s14 = int_to_ptr.hbm [resolvable:$true] %s16_s14 }
   0x3   :  { %s18_s16 = sshll.u32 %s189_s15, 4  ;;  %s26_s19 = sshll.u32 %s227_s1, 4  ;;  %s19_s16 = int_to_ptr.vmem [resolvable:$true] %s18_s16  ;;  %s27_s19 = int_to_ptr.hbm [resolvable:$true] %s26_s19 }
   0x4   :  { %21 = dma.hbm_to_vmem [thread:$0]  %s17_s14, 32, %s19_s16, [#allocation3]  }
   0x5   :  { %s190_s20 = smov [#allocation5]   ;;  %s191_s22 = smov 128  }
   0x6   :  { %s28_s21 = sshll.u32 %s190_s20, 4  ;;  %s192_s23 = smov 8   ;;  %s29_s21 = int_to_ptr.vmem [resolvable:$true] %s28_s21 }
   0x7   :  { %34 = dma.hbm_to_vmem [thread:$0]  %s27_s19, 1024, %s29_s21, [#allocation6], %s191_s22, %s191_s22, %s192_s23  }
   0x8   :  { %183 = dma.done.wait [#allocation3], 32  }
   0x9   :  { %184 = vsyncadd [#allocation3], 4294967264 }
   0xa   :  { %185 = dma.done.wait [#allocation6], 1024  }
   0xb   :  { %186 = vsyncadd [#allocation6], 4294966272  ;;  %v53_v0 = vld [vmem:[#allocation5 + $0x38] sm:$0xff]  ;;  %v52_v1 = vld [vmem:[#allocation5 + $0x30] sm:$0xff]  ;;  %vm58_vm0 = vcmask 523264   ;;  %s193_s24 = smov [#allocation7]  }
   0xc   :  { %70 = vmatpush.msra.mxu0 %v53_v0  ;;  %v51_v2 = vld [vmem:[#allocation5 + $0x28] sm:$0xff]  ;;  %v50_v3 = vld [vmem:[#allocation5 + $0x20] sm:$0xff]  ;;  %v49_v4 = vld [vmem:[#allocation5 + $0x18] sm:$0xff]  ;;  %s89_s25 = sshll.u32 %s193_s24, 4  ;;  %s91_s28 = sshll.u32 %s229_s3, 4  ;;  %s90_s25 = int_to_ptr.vmem [resolvable:$true] %s89_s25  ;;  %s92_s28 = int_to_ptr.hbm [resolvable:$true] %s91_s28 }
   0xd   :  { %v48_v5 = vld [vmem:[#allocation5 + $0x10] sm:$0xff]  ;;  %v47_v6 = vld [vmem:[#allocation5 + $0x8] sm:$0xff]  ;;  %v46_v7 = vld [vmem:[#allocation5] sm:$0xff] }
   0xe   :  { %71 = vmatpush.msra.mxu0 %v52_v1  ;;  %v45_v8 = vld [vmem:[#allocation2] sm:$0x3] }
   0xf   :  { %v108_v9 = vld [vmem:[%s228_s2] ss:$0 sm:$0xff] }
  0x10   :  { %72 = vmatpush.msra.mxu0 %v51_v2 }
  0x12   :  { %73 = vmatpush.msra.mxu0 %v50_v3 }
  0x14   :  { %74 = vmatpush.msra.mxu0 %v49_v4 }
  0x16   :  { %75 = vmatpush.msra.mxu0 %v48_v5 }
  0x18   :  { %76 = vmatpush.msra.mxu0 %v47_v6 }
  0x1a   :  { %77 = vmatpush.msra.mxu0 %v46_v7 }
  0x1b   :  { %102 = vmatmul.msk.f32.vlgmr.msra.gmra.mxu0 %vm58_vm0, %v45_v8 }
  0x98   :  { %v79_v10 = vpop.f32.mrf.mxu0 }
  0x99   :  { %v80_v11 = vadd.f32 %v108_v9, %v79_v10 }
  0x9b   :  { %109 = vtanh.f32 %v80_v11 }
  0xa1   :  { %v110_v12 = vpop.eup %109 }
  0xa2   :  { %83 = vst [vmem:[#allocation7] sm:$0x3] %v110_v12 }
  0xa3   :  { %94 = dma.vmem_to_hbm [thread:$0]  %s90_s25, 32, %s92_s28, [#allocation4]  }
  0xa4   :  { %187 = dma.done.wait [#allocation4], 32  }
  0xa5   :  { %188 = vsyncadd [#allocation4], 4294967264 }
  0xa6   :  { %99 = vsyncpa [#allocation3], 1 }
  0xa7   :  { %100 = vsyncpa [#allocation6], 1 }
  0xa8   :  { %101 = vsyncpa [#allocation4], 1 }

</bundles_post_ra>
